<compile_context>
chip_gen: v7x
topology: tpu7x:2x2x1
jax: 0.10.0
libtpu: 0.0.40
codegen_flags: <defaults>
</compile_context>

<pallas_src>
import functools

import numpy as np
import jax
import jax.numpy as jnp
from jax.experimental import pallas as pl
from jax.experimental.pallas import tpu as pltpu


# ---------------------------------------------------------------------------
# Shared math: tiny MLP + uncertainty head (column convention, all f32).
#   pooled : (S, 2)   col0 = per-slice max, col1 = per-slice mean
#   returns: (S, 1)   att = sigmoid(mean + lowrank + sqrt(diag) * eps_d)
# Usable both on values loaded inside a kernel and on plain JAX arrays.
# ---------------------------------------------------------------------------
def _attention_head(pooled, w1, b1, w2, b2, wmd, bmd, eps_d):
    s = pooled.shape[0]
    h = jnp.maximum(
        jnp.dot(w1, pooled, preferred_element_type=jnp.float32) + b1, 0.0)    # (H1, 2)
    out = jnp.dot(w2, h, preferred_element_type=jnp.float32) + b2             # (S, 2)
    temp = jnp.maximum(out[:, 0:1] + out[:, 1:2], 0.0)                        # relu(mlp(max)+mlp(avg))
    md = jnp.dot(wmd, temp, preferred_element_type=jnp.float32) + bmd         # (2S, 1)
    sample = md[0:s, :] + jnp.exp(0.5 * md[s:2 * s, :]) * eps_d               # mean+lowrank + sqrt(diag)*eps
    return jax.nn.sigmoid(sample)


# ---------------------------------------------------------------------------
# Path A: whole x resident in VMEM -> single fused kernel (1 HBM read + 1 HBM write).
# ---------------------------------------------------------------------------
def fused_kernel(x_ref, w1_ref, b1_ref, w2_ref, b2_ref, wmd_ref, bmd_ref, epsd_ref,
                 y_ref, att_ref, *, chw):
    s = x_ref.shape[0]
    x = x_ref[...]                                                   # (S, CHW) slab
    pmax = jnp.max(x, axis=1, keepdims=True).astype(jnp.float32)     # max is exact in any dtype
    pmean = jnp.sum(x.astype(jnp.float32), axis=1, keepdims=True) * (1.0 / chw)
    col = jax.lax.broadcasted_iota(jnp.int32, (s, 2), 1)
    pooled = jnp.where(col == 0, pmax, pmean)                        # (S, 2), no lane concat
    att = _attention_head(pooled, w1_ref[...], b1_ref[...], w2_ref[...], b2_ref[...],
                          wmd_ref[...], bmd_ref[...], epsd_ref[...])
    att_ref[...] = att
    y_ref[...] = (x.astype(jnp.float32) * att).astype(y_ref.dtype)


# ---------------------------------------------------------------------------
# Path B phase 1: streaming partial (max, sum) reduction.
#   grid = (P, nkp); axis 0 "parallel" (v7x dual TensorCore), axis 1 "arbitrary".
#   Elementwise (S, SUB) running accumulators; cross-lane reduce only at finalize.
# ---------------------------------------------------------------------------
def partial_reduce_kernel(x_ref, part_ref, max_acc, sum_acc, *, chw, chunk, sub, masked):
    p = pl.program_id(0)
    k = pl.program_id(1)
    nkp = pl.num_programs(1)
    s = max_acc.shape[0]

    @pl.when(k == 0)
    def _init():
        max_acc[...] = jnp.full(max_acc.shape, -jnp.inf, dtype=jnp.float32)
        sum_acc[...] = jnp.zeros(sum_acc.shape, dtype=jnp.float32)

    base = (p * nkp + k) * chunk                   # global lane offset of this tile

    if sub is not None:
        # Hot loop: static slices, elementwise max/add only (no per-step XLU reduces,
        # no width-1 masked stores).
        lane = jax.lax.broadcasted_iota(jnp.int32, (s, sub), 1)
        for c in range(chunk // sub):
            xs = x_ref[:, c * sub:(c + 1) * sub].astype(jnp.float32)
            if masked:
                valid = (base + c * sub + lane) < chw
                xm = jnp.where(valid, xs, -jnp.inf)
                xa = jnp.where(valid, xs, 0.0)
            else:
                xm, xa = xs, xs
            max_acc[...] = jnp.maximum(max_acc[...], xm)
            sum_acc[...] = sum_acc[...] + xa
    else:
        # Tile not lane-aligned (only when the whole CHW is a single tile): one
        # cross-lane reduce per tile is fine.
        xs = x_ref[...].astype(jnp.float32)
        if masked:
            lane = jax.lax.broadcasted_iota(jnp.int32, xs.shape, 1)
            valid = (base + lane) < chw
            xm = jnp.where(valid, xs, -jnp.inf)
            xa = jnp.where(valid, xs, 0.0)
        else:
            xm, xa = xs, xs
        max_acc[:, 0:1] = jnp.maximum(max_acc[:, 0:1],
                                      jnp.max(xm, axis=1, keepdims=True))
        sum_acc[:, 0:1] = sum_acc[:, 0:1] + jnp.sum(xa, axis=1, keepdims=True)

    @pl.when(k == nkp - 1)
    def _finalize():
        pmax = jnp.max(max_acc[...], axis=1, keepdims=True)
        psum = jnp.sum(sum_acc[...], axis=1, keepdims=True)
        col = jax.lax.broadcasted_iota(jnp.int32, (s, 2), 1)
        part_ref[0] = jnp.where(col == 0, pmax, psum)


# ---------------------------------------------------------------------------
# Path B phase 2: streaming y = x * att (megacore-parallel, lane-dense tiles).
# ---------------------------------------------------------------------------
def scale_kernel(x_ref, att_ref, y_ref):
    y_ref[...] = (x_ref[...].astype(jnp.float32) * att_ref[...]).astype(y_ref.dtype)


# ---------------------------------------------------------------------------
# Wrapper.
# ---------------------------------------------------------------------------
def _vmem_capacity_bytes():
    try:
        info = pltpu.get_tpu_info()
        return int(getattr(info, "vmem_capacity_bytes", 64 * 1024 * 1024))
    except Exception:
        return 64 * 1024 * 1024


def _compiler_params(dimension_semantics, vmem_need_bytes, vmem_cap_bytes):
    kwargs = dict(dimension_semantics=dimension_semantics)
    # Raise the scoped VMEM limit only when the default (16/32 MiB) is too small, and
    # never above 7/8 of the chip's physical VMEM (64 MiB v7x, 128 MiB v5e/v6e) so
    # double-buffering stays intact.
    if vmem_need_bytes > 15 * 1024 * 1024:
        kwargs["vmem_limit_bytes"] = int(min(vmem_need_bytes * 3 // 2,
                                             vmem_cap_bytes * 7 // 8))
    return pltpu.CompilerParams(**kwargs)


def _pick_sub(chunk):
    for sub in (2048, 1024, 512, 256, 128):
        if chunk % sub == 0:
            return sub
    return None


def slice_attention_forward(x, params, eps_w, eps_d, rank, *,
                            block_chw=16384, fuse_vmem_bytes=None):
    """Forward pass of SliceAttentionModule. Returns (y, att); y.shape == x.shape."""
    S, C, H, W = x.shape
    CHW = C * H * W
    x2d = x.reshape(S, CHW)
    itemsize = x.dtype.itemsize

    # ---- host-side algebraic folding (the Gaussian noise is fixed at call time) ----
    # factor.view(S, rank) @ eps_w folds into the mean weights; the mean and log_diag
    # heads are then stacked into a single (2S, S) matmul.
    f32 = jnp.float32
    wf3 = params["wf"].reshape(S, rank, S).astype(f32)
    bf2 = params["bf"].reshape(S, rank).astype(f32)
    wm_eff = params["wm"].astype(f32) + jnp.einsum("r,srk->sk", eps_w.astype(f32), wf3)
    bm_eff = params["bm"].astype(f32) + jnp.einsum("r,sr->s", eps_w.astype(f32), bf2)[:, None]
    wmd = jnp.concatenate([wm_eff, params["wd"].astype(f32)], axis=0)   # (2S, S)
    bmd = jnp.concatenate([bm_eff, params["bd"].astype(f32)], axis=0)   # (2S, 1)
    w1 = params["w1"].astype(f32); b1 = params["b1"].astype(f32)
    w2 = params["w2"].astype(f32); b2 = params["b2"].astype(f32)
    eps_d_col = eps_d.reshape(S, 1).astype(f32)

    vmem_cap = _vmem_capacity_bytes()
    if fuse_vmem_bytes is None:
        fuse_vmem_bytes = vmem_cap // 8        # ~8 MiB on v7x, ~16 MiB on v5e/v6e
    slab_bytes = S * CHW * itemsize

    def const_spec(arr):
        nd = arr.ndim
        return pl.BlockSpec(arr.shape, lambda *_: (0,) * nd)

    # ------------------------- Path A: fused single pass -------------------------
    if slab_bytes <= fuse_vmem_bytes:
        need = 4 * slab_bytes + S * CHW * 4 + (1 << 20)
        y2d, att = pl.pallas_call(
            functools.partial(fused_kernel, chw=CHW),
            out_shape=(jax.ShapeDtypeStruct((S, CHW), x.dtype),
                       jax.ShapeDtypeStruct((S, 1), jnp.float32)),
            grid=(1,),
            in_specs=[const_spec(x2d), const_spec(w1), const_spec(b1),
                      const_spec(w2), const_spec(b2), const_spec(wmd),
                      const_spec(bmd), const_spec(eps_d_col)],
            out_specs=(pl.BlockSpec((S, CHW), lambda i: (0, 0)),
                       pl.BlockSpec((S, 1), lambda i: (0, 0))),
            compiler_params=_compiler_params(("arbitrary",), need, vmem_cap),
            cost_estimate=pl.CostEstimate(flops=3 * S * CHW, transcendentals=8 * S,
                                          bytes_accessed=2 * S * CHW * itemsize),
        )(x2d, w1, b1, w2, b2, wmd, bmd, eps_d_col)
        return y2d.reshape(S, C, H, W), att

    # ------------------------- Path B: streaming two-pass -------------------------
    bc = max(128, (block_chw // 128) * 128)           # lane-dense tile, multiple of 128
    T = CHW if CHW <= bc else bc
    nk = -(-CHW // T)
    # Split the CHW range across the two v7x TensorCores whenever the chunk count is
    # even (harmless serial outer loop on v5e/v6e, which have a single TensorCore).
    P = 2 if (nk % 2 == 0 and nk >= 2) else 1
    nkp = nk // P
    masked = (nk * T != CHW)                           # ragged last tile
    sub = _pick_sub(T)
    sub_eff = sub if sub is not None else 128
    tile_bytes = S * T * itemsize

    need1 = 4 * tile_bytes + 2 * S * sub_eff * 4 + (1 << 20)
    partials = pl.pallas_call(
        functools.partial(partial_reduce_kernel, chw=CHW, chunk=T, sub=sub,
                          masked=masked),
        out_shape=jax.ShapeDtypeStruct((P, S, 2), jnp.float32),
        grid=(P, nkp),
        in_specs=[pl.BlockSpec((S, T), lambda p, k: (0, p * nkp + k))],
        out_specs=pl.BlockSpec((1, S, 2), lambda p, k: (p, 0, 0)),
        scratch_shapes=[pltpu.VMEM((S, sub_eff), jnp.float32),
                        pltpu.VMEM((S, sub_eff), jnp.float32)],
        compiler_params=_compiler_params(("parallel", "arbitrary"), need1, vmem_cap),
        cost_estimate=pl.CostEstimate(flops=2 * S * CHW, transcendentals=0,
                                      bytes_accessed=S * CHW * itemsize),
    )(x2d)

    # Tiny epilogue + MLP/uncertainty head: a handful of (<=2S x S) ops fused by XLA.
    # Keeping it out of the kernel is what lets phase 1 shard over both v7x cores.
    pooled_max = jnp.max(partials[:, :, 0], axis=0)[:, None]
    pooled_mean = (jnp.sum(partials[:, :, 1], axis=0) * (1.0 / CHW))[:, None]
    pooled = jnp.concatenate([pooled_max, pooled_mean], axis=1)          # (S, 2)
    att = _attention_head(pooled, w1, b1, w2, b2, wmd, bmd, eps_d_col)   # (S, 1) f32

    need2 = 8 * tile_bytes + (1 << 20)
    y2d = pl.pallas_call(
        scale_kernel,
        out_shape=jax.ShapeDtypeStruct((S, CHW), x.dtype),
        grid=(nk,),
        in_specs=[pl.BlockSpec((S, T), lambda k: (0, k)),
                  pl.BlockSpec((S, 1), lambda k: (0, 0))],
        out_specs=pl.BlockSpec((S, T), lambda k: (0, k)),
        compiler_params=_compiler_params(("parallel",), need2, vmem_cap),
        cost_estimate=pl.CostEstimate(flops=S * CHW, transcendentals=0,
                                      bytes_accessed=2 * S * CHW * itemsize),
    )(x2d, att)
    return y2d.reshape(S, C, H, W), att


# ---------------------------------------------------------------------------
# Pure-JAX reference mirroring the PyTorch module (row-vector convention).
# ---------------------------------------------------------------------------
def reference_forward(x, params, eps_w, eps_d, rank):
    S = x.shape[0]
    xf = x.reshape(S, -1)
    max_x = jnp.max(xf, axis=1)[None, :]
    avg_x = jnp.mean(xf, axis=1)[None, :]

    def mlp(v):
        h = jax.nn.relu(v @ params["w1"].T + params["b1"].T)
        return h @ params["w2"].T + params["b2"].T

    att = mlp(max_x) + mlp(avg_x)
    temp = jax.nn.relu(att)
    mean = temp @ params["wm"].T + params["bm"].T
    diag = jnp.exp(temp @ params["wd"].T + params["bd"].T)
    factor = (temp @ params["wf"].T + params["bf"].T).reshape(S, rank)
    sample = mean + (factor @ eps_w)[None, :] + jnp.sqrt(diag) * eps_d[None, :]
    att_s = jax.nn.sigmoid(sample)[0]
    return x * att_s[:, None, None, None]


if __name__ == "__main__":
    S, C, H, W = 8, 4, 16, 16        # in_features = S (slice axis)
    rate, rank = 4, 5
    H1 = S * rate

    key = jax.random.PRNGKey(0)
    keys = jax.random.split(key, 16)

    def linear_params(kw, kb, fan_in, fan_out):
        lim = 1.0 / np.sqrt(fan_in)
        w = jax.random.uniform(kw, (fan_out, fan_in), jnp.float32, -lim, lim)
        b = jax.random.uniform(kb, (fan_out, 1), jnp.float32, -lim, lim)
        return w, b

    params = {}
    params["w1"], params["b1"] = linear_params(keys[0], keys[1], S, H1)
    params["w2"], params["b2"] = linear_params(keys[2], keys[3], H1, S)
    params["wm"], params["bm"] = linear_params(keys[4], keys[5], S, S)
    params["wd"], params["bd"] = linear_params(keys[6], keys[7], S, S)
    params["wf"], params["bf"] = linear_params(keys[8], keys[9], S, S * rank)

    x = jax.random.normal(keys[10], (S, C, H, W), jnp.float32)
    # Deterministic reparameterization noise for the LowRankMultivariateNormal sample
    # (dist.sample() = loc + cov_factor @ eps_W + sqrt(cov_diag) * eps_D).
    eps_w = jax.random.normal(keys[11], (rank,), jnp.float32)
    eps_d = jax.random.normal(keys[12], (S,), jnp.float32)

    y_ref = np.asarray(reference_forward(x, params, eps_w, eps_d, rank))

    # 1) default: fused single-pass VMEM-resident kernel (Path A).
    y1, att1 = slice_attention_forward(x, params, eps_w, eps_d, rank)
    y1 = np.asarray(jax.block_until_ready(y1))
    assert np.allclose(y1, y_ref, rtol=1e-5, atol=1e-5), "fused path mismatch"

    # 2) forced two-pass streaming path (Path B), even chunk count -> dual-core split.
    y2, _ = slice_attention_forward(x, params, eps_w, eps_d, rank,
                                    block_chw=128, fuse_vmem_bytes=0)
    y2 = np.asarray(jax.block_until_ready(y2))
    assert np.allclose(y2, y_ref, rtol=1e-5, atol=1e-5), "two-pass path mismatch"

    # 3) forced two-pass path with a ragged last tile (OOB-lane masking exercised).
    y3, _ = slice_attention_forward(x, params, eps_w, eps_d, rank,
                                    block_chw=640, fuse_vmem_bytes=0)
    y3 = np.asarray(jax.block_until_ready(y3))
    assert np.allclose(y3, y_ref, rtol=1e-5, atol=1e-5), "ragged two-pass mismatch"

    # 4) bf16 activations through the fused path (pooling/head still accumulate in f32).
    xb = x.astype(jnp.bfloat16)
    y_ref_b = np.asarray(reference_forward(xb.astype(jnp.float32), params, eps_w, eps_d, rank))
    y4, _ = slice_attention_forward(xb, params, eps_w, eps_d, rank)
    y4 = np.asarray(jax.block_until_ready(y4)).astype(np.float32)
    assert np.allclose(y4, y_ref_b, rtol=2e-2, atol=2e-2), "bf16 path mismatch"

    print("KERNEL_OK")
</pallas_src>

<mosaic_0001>
module attributes {stable_mosaic.version = 11 : i64} {
  func.func @fused_kernel(%arg0: i32, %arg1: memref<8x1024xf32, #tpu.memory_space<vmem>>, %arg2: memref<32x8xf32, #tpu.memory_space<vmem>>, %arg3: memref<32x1xf32, #tpu.memory_space<vmem>>, %arg4: memref<8x32xf32, #tpu.memory_space<vmem>>, %arg5: memref<8x1xf32, #tpu.memory_space<vmem>>, %arg6: memref<16x8xf32, #tpu.memory_space<vmem>>, %arg7: memref<16x1xf32, #tpu.memory_space<vmem>>, %arg8: memref<8x1xf32, #tpu.memory_space<vmem>>, %arg9: memref<8x1024xf32, #tpu.memory_space<vmem>>, %arg10: memref<8x1xf32, #tpu.memory_space<vmem>>) attributes {dimension_semantics = [#tpu.dimension_semantics<arbitrary>], iteration_bounds = array<i64: 1>, scalar_prefetch = 0 : i64, scratch_operands = 0 : i64, tpu.core_type = #tpu.core_type<tc>, window_params = [{pipeline_mode = #tpu.pipeline_mode<synchronous>, transform_indices = @transform_0, window_bounds = array<i64: 8, 1024>}, {pipeline_mode = #tpu.pipeline_mode<synchronous>, transform_indices = @transform_1, window_bounds = array<i64: 32, 8>}, {pipeline_mode = #tpu.pipeline_mode<synchronous>, transform_indices = @transform_2, window_bounds = array<i64: 32, 1>}, {pipeline_mode = #tpu.pipeline_mode<synchronous>, transform_indices = @transform_3, window_bounds = array<i64: 8, 32>}, {pipeline_mode = #tpu.pipeline_mode<synchronous>, transform_indices = @transform_4, window_bounds = array<i64: 8, 1>}, {pipeline_mode = #tpu.pipeline_mode<synchronous>, transform_indices = @transform_5, window_bounds = array<i64: 16, 8>}, {pipeline_mode = #tpu.pipeline_mode<synchronous>, transform_indices = @transform_6, window_bounds = array<i64: 16, 1>}, {pipeline_mode = #tpu.pipeline_mode<synchronous>, transform_indices = @transform_7, window_bounds = array<i64: 8, 1>}, {pipeline_mode = #tpu.pipeline_mode<synchronous>, transform_indices = @transform_8, window_bounds = array<i64: 8, 1024>}, {pipeline_mode = #tpu.pipeline_mode<synchronous>, transform_indices = @transform_9, window_bounds = array<i64: 8, 1>}]} {
    %c0 = arith.constant 0 : index
    %c0_0 = arith.constant 0 : index
    %0 = vector.load %arg1[%c0, %c0_0] : memref<8x1024xf32, #tpu.memory_space<vmem>>, vector<8x1024xf32>
    %cst = arith.constant dense<0xFF800000> : vector<8xf32>
    %1 = vector.multi_reduction <maximumf>, %0, %cst [1] : vector<8x1024xf32> to vector<8xf32>
    %2 = vector.shape_cast %1 : vector<8xf32> to vector<8x1xf32>
    %cst_1 = arith.constant dense<0.000000e+00> : vector<8xf32>
    %3 = vector.multi_reduction <add>, %0, %cst_1 [1] : vector<8x1024xf32> to vector<8xf32>
    %4 = vector.shape_cast %3 : vector<8xf32> to vector<8x1xf32>
    %cst_2 = arith.constant 9.765625E-4 : f32
    %5 = vector.broadcast %cst_2 : f32 to vector<8x1xf32>
    %6 = arith.mulf %4, %5 : vector<8x1xf32>
    %7 = tpu.iota {dimensions = array<i32: 1>} : vector<8x2xi32>
    %c0_i32 = arith.constant 0 : i32
    %8 = vector.broadcast %c0_i32 : i32 to vector<8x2xi32>
    %9 = arith.cmpi eq, %7, %8 : vector<8x2xi32>
    %10 = vector.shape_cast %2 : vector<8x1xf32> to vector<8x1xf32>
    %11 = vector.broadcast %10 : vector<8x1xf32> to vector<8x2xf32>
    %12 = vector.shape_cast %6 : vector<8x1xf32> to vector<8x1xf32>
    %13 = vector.broadcast %12 : vector<8x1xf32> to vector<8x2xf32>
    %14 = arith.select %9, %11, %13 : vector<8x2xi1>, vector<8x2xf32>
    %c0_3 = arith.constant 0 : index
    %c0_4 = arith.constant 0 : index
    %15 = vector.load %arg2[%c0_3, %c0_4] : memref<32x8xf32, #tpu.memory_space<vmem>>, vector<32x8xf32>
    %c0_5 = arith.constant 0 : index
    %c0_6 = arith.constant 0 : index
    %16 = vector.load %arg3[%c0_5, %c0_6] : memref<32x1xf32, #tpu.memory_space<vmem>>, vector<32x1xf32>
    %c0_7 = arith.constant 0 : index
    %c0_8 = arith.constant 0 : index
    %17 = vector.load %arg4[%c0_7, %c0_8] : memref<8x32xf32, #tpu.memory_space<vmem>>, vector<8x32xf32>
    %c0_9 = arith.constant 0 : index
    %c0_10 = arith.constant 0 : index
    %18 = vector.load %arg5[%c0_9, %c0_10] : memref<8x1xf32, #tpu.memory_space<vmem>>, vector<8x1xf32>
    %c0_11 = arith.constant 0 : index
    %c0_12 = arith.constant 0 : index
    %19 = vector.load %arg6[%c0_11, %c0_12] : memref<16x8xf32, #tpu.memory_space<vmem>>, vector<16x8xf32>
    %c0_13 = arith.constant 0 : index
    %c0_14 = arith.constant 0 : index
    %20 = vector.load %arg7[%c0_13, %c0_14] : memref<16x1xf32, #tpu.memory_space<vmem>>, vector<16x1xf32>
    %c0_15 = arith.constant 0 : index
    %c0_16 = arith.constant 0 : index
    %21 = vector.load %arg8[%c0_15, %c0_16] : memref<8x1xf32, #tpu.memory_space<vmem>>, vector<8x1xf32>
    %cst_17 = arith.constant dense<0.000000e+00> : vector<32x2xf32>
    %22 = tpu.matmul %15, %14, %cst_17 {dimension_numbers = #tpu.dot_dimension_numbers<[1], [0], [0], [1], [0, 0, 1, 1], [], []>} : vector<32x8xf32>, vector<8x2xf32>, vector<32x2xf32> -> vector<32x2xf32>
    %23 = vector.broadcast %16 : vector<32x1xf32> to vector<32x2xf32>
    %24 = arith.addf %22, %23 : vector<32x2xf32>
    %cst_18 = arith.constant 0.000000e+00 : f32
    %25 = vector.broadcast %cst_18 : f32 to vector<32x2xf32>
    %26 = arith.maximumf %24, %25 : vector<32x2xf32>
    %cst_19 = arith.constant dense<0.000000e+00> : vector<8x2xf32>
    %27 = tpu.matmul %17, %26, %cst_19 {dimension_numbers = #tpu.dot_dimension_numbers<[1], [0], [0], [1], [0, 0, 1, 1], [], []>} : vector<8x32xf32>, vector<32x2xf32>, vector<8x2xf32> -> vector<8x2xf32>
    %28 = vector.broadcast %18 : vector<8x1xf32> to vector<8x2xf32>
    %29 = arith.addf %27, %28 : vector<8x2xf32>
    %30 = vector.extract_strided_slice %29 {offsets = [0, 0], sizes = [8, 1], strides = [1, 1]} : vector<8x2xf32> to vector<8x1xf32>
    %31 = vector.extract_strided_slice %29 {offsets = [0, 1], sizes = [8, 1], strides = [1, 1]} : vector<8x2xf32> to vector<8x1xf32>
    %32 = arith.addf %30, %31 : vector<8x1xf32>
    %cst_20 = arith.constant 0.000000e+00 : f32
    %33 = vector.broadcast %cst_20 : f32 to vector<8x1xf32>
    %34 = arith.maximumf %32, %33 : vector<8x1xf32>
    %cst_21 = arith.constant dense<0.000000e+00> : vector<16x1xf32>
    %35 = tpu.matmul %19, %34, %cst_21 {dimension_numbers = #tpu.dot_dimension_numbers<[1], [0], [0], [1], [0, 0, 1, 1], [], []>} : vector<16x8xf32>, vector<8x1xf32>, vector<16x1xf32> -> vector<16x1xf32>
    %36 = arith.addf %35, %20 : vector<16x1xf32>
    %37 = vector.extract_strided_slice %36 {offsets = [0, 0], sizes = [8, 1], strides = [1, 1]} : vector<16x1xf32> to vector<8x1xf32>
    %38 = vector.extract_strided_slice %36 {offsets = [8, 0], sizes = [8, 1], strides = [1, 1]} : vector<16x1xf32> to vector<8x1xf32>
    %cst_22 = arith.constant 5.000000e-01 : f32
    %39 = vector.broadcast %cst_22 : f32 to vector<8x1xf32>
    %40 = arith.mulf %39, %38 : vector<8x1xf32>
    %41 = math.exp %40 : vector<8x1xf32>
    %42 = arith.mulf %41, %21 : vector<8x1xf32>
    %43 = arith.addf %37, %42 : vector<8x1xf32>
    %44 = arith.negf %43 : vector<8x1xf32>
    %45 = math.exp %44 : vector<8x1xf32>
    %cst_23 = arith.constant 1.000000e+00 : f32
    %46 = vector.broadcast %cst_23 : f32 to vector<8x1xf32>
    %47 = arith.addf %46, %45 : vector<8x1xf32>
    %48 = arith.divf %46, %47 : vector<8x1xf32>
    %c0_24 = arith.constant 0 : index
    %c0_25 = arith.constant 0 : index
    %49 = vector.load %arg10[%c0_24, %c0_25] : memref<8x1xf32, #tpu.memory_space<vmem>>, vector<8x1xf32>
    tpu.vector_store %arg10[%c0_24, %c0_25], %48 {strides = array<i32>} : memref<8x1xf32, #tpu.memory_space<vmem>>, vector<8x1xf32>,
    %50 = vector.broadcast %48 : vector<8x1xf32> to vector<8x1024xf32>
    %51 = arith.mulf %0, %50 : vector<8x1024xf32>
    %c0_26 = arith.constant 0 : index
    %c0_27 = arith.constant 0 : index
    %52 = vector.load %arg9[%c0_26, %c0_27] : memref<8x1024xf32, #tpu.memory_space<vmem>>, vector<8x1024xf32>
    tpu.vector_store %arg9[%c0_26, %c0_27], %51 {strides = array<i32>} : memref<8x1024xf32, #tpu.memory_space<vmem>>, vector<8x1024xf32>,
    return
  }
  func.func @transform_0(%arg0: i32) -> (i32, i32) {
    %c0_i32 = arith.constant 0 : i32
    %c0_i32_0 = arith.constant 0 : i32
    %c0_i32_1 = arith.constant 0 : i32
    return %c0_i32, %c0_i32_0 : i32, i32
  }
  func.func @transform_1(%arg0: i32) -> (i32, i32) {
    %c0_i32 = arith.constant 0 : i32
    %c0_i32_0 = arith.constant 0 : i32
    %c0_i32_1 = arith.constant 0 : i32
    return %c0_i32, %c0_i32_0 : i32, i32
  }
  func.func @transform_2(%arg0: i32) -> (i32, i32) {
    %c0_i32 = arith.constant 0 : i32
    %c0_i32_0 = arith.constant 0 : i32
    %c0_i32_1 = arith.constant 0 : i32
    return %c0_i32, %c0_i32_0 : i32, i32
  }
  func.func @transform_3(%arg0: i32) -> (i32, i32) {
    %c0_i32 = arith.constant 0 : i32
    %c0_i32_0 = arith.constant 0 : i32
    %c0_i32_1 = arith.constant 0 : i32
    return %c0_i32, %c0_i32_0 : i32, i32
  }
  func.func @transform_4(%arg0: i32) -> (i32, i32) {
    %c0_i32 = arith.constant 0 : i32
    %c0_i32_0 = arith.constant 0 : i32
    %c0_i32_1 = arith.constant 0 : i32
    return %c0_i32, %c0_i32_0 : i32, i32
  }
  func.func @transform_5(%arg0: i32) -> (i32, i32) {
    %c0_i32 = arith.constant 0 : i32
    %c0_i32_0 = arith.constant 0 : i32
    %c0_i32_1 = arith.constant 0 : i32
    return %c0_i32, %c0_i32_0 : i32, i32
  }
  func.func @transform_6(%arg0: i32) -> (i32, i32) {
    %c0_i32 = arith.constant 0 : i32
    %c0_i32_0 = arith.constant 0 : i32
    %c0_i32_1 = arith.constant 0 : i32
    return %c0_i32, %c0_i32_0 : i32, i32
  }
  func.func @transform_7(%arg0: i32) -> (i32, i32) {
    %c0_i32 = arith.constant 0 : i32
    %c0_i32_0 = arith.constant 0 : i32
    %c0_i32_1 = arith.constant 0 : i32
    return %c0_i32, %c0_i32_0 : i32, i32
  }
  func.func @transform_8(%arg0: i32) -> (i32, i32) {
    %c0_i32 = arith.constant 0 : i32
    %c0_i32_0 = arith.constant 0 : i32
    %c0_i32_1 = arith.constant 0 : i32
    return %c0_i32, %c0_i32_0 : i32, i32
  }
  func.func @transform_9(%arg0: i32) -> (i32, i32) {
    %c0_i32 = arith.constant 0 : i32
    %c0_i32_0 = arith.constant 0 : i32
    %c0_i32_1 = arith.constant 0 : i32
    return %c0_i32, %c0_i32_0 : i32, i32
  }
}

</mosaic_0001>

<bundles_post_ra>
// kernel: tpu_custom_call.1
= control target key start
LH: loop header
LB: loop body
LE: loop exit
PB: predicated region body
PF: predicated region fallthrough
CT: control target
= control target key end

     0   :  { %s693_s0 = inlined_call_operand.vmem [shape: f32[8,1024], index: 0, kind: input, shape index: {}]   ;;  %s694_s1 = inlined_call_operand.vmem [shape: f32[32,8], index: 1, kind: input, shape index: {}]   ;;  %s695_s2 = inlined_call_operand.vmem [shape: f32[32,1], index: 2, kind: input, shape index: {}]   ;;  %s696_s3 = inlined_call_operand.vmem [shape: f32[8,32], index: 3, kind: input, shape index: {}]   ;;  %s697_s4 = inlined_call_operand.vmem [shape: f32[8,1], index: 4, kind: input, shape index: {}]   ;;  %s698_s5 = inlined_call_operand.vmem [shape: f32[16,8], index: 5, kind: input, shape index: {}]   ;;  %s699_s6 = inlined_call_operand.vmem [shape: f32[16,1], index: 6, kind: input, shape index: {}]   ;;  %s700_s7 = inlined_call_operand.vmem [shape: f32[8,1], index: 7, kind: input, shape index: {}]   ;;  %s701_s8 = inlined_call_operand.hbm [shape: f32[8,1024], index: 8, kind: output, shape index: {0}]   ;;  %s702_s9 = inlined_call_operand.vmem [shape: f32[8,1], index: 9, kind: output, shape index: {1}]  }
   0x1   :  { %v566_v0 = vld [vmem:[%s693_s0] sm:$0xff]  ;;  %v571_v1 = vld [vmem:[%s693_s0 + $0x8] sm:$0xff]  ;;  %v576_v2 = vld [vmem:[%s693_s0 + $0x10] sm:$0xff] }
   0x2   :  { %v49_v3 = vadd.f32 %v571_v1, %v566_v0  ;;  %v583_v4 = vld [vmem:[%s693_s0 + $0x18] sm:$0xff] }
   0x3   :  { %15 = vsyncpa [#allocation3], 0  ;;  %v589_v6 = vld [vmem:[%s693_s0 + $0x20] sm:$0xff]  ;;  %v594_v7 = vld [vmem:[%s693_s0 + $0x38] sm:$0xff]  ;;  %vm98_vm0 = vcmask 64512   ;;  %v507_v24 = vmov 0   ;;  %v59_v29 = vlaneseq }
   0x4   :  { %v50_v5 = vadd.f32 %v49_v3, %v576_v2  ;;  %v600_v9 = vld [vmem:[%s693_s0 + $0x28] sm:$0xff]  ;;  %v605_v10 = vld [vmem:[%s693_s0 + $0x30] sm:$0xff]  ;;  %v40_v11 = vmax.f32 %v566_v0, %v589_v6  ;;  %v43_v12 = vmax.f32 %v583_v4, %v594_v7  ;;  %v63_v22 = vld [vmem:[%s694_s1] sm:$0xff]  ;;  %475 = vset.pattern.permute.xlu1 %v507_v24  ;;  %476 = vset.pattern.permute.xlu0 %v507_v24  ;;  %v508_v38 = vmov 0.0|0.0   ;;  %s511_s22 = smov 127  }
   0x5   :  { %v41_v14 = vmax.f32 %v571_v1, %v600_v9  ;;  %v42_v15 = vmax.f32 %v576_v2, %v605_v10  ;;  %441 = vmatprep.mubr.msk.f32.mxu0 %vm98_vm0, %v63_v22  ;;  %v67_v23 = vld [vmem:[%s695_s2] sm:$0xff]  ;;  %v69_v25 = vld [vmem:[%s695_s2 + $0x10] sm:$0xff]  ;;  %v68_v26 = vld [vmem:[%s695_s2 + $0x8] sm:$0xff]  ;;  %v60_v30 = vand.u32 127, %v59_v29  ;;  %463 = vmatprep.subr.bf16.mxu1 %v508_v38  ;;  %vm509_vm2 = vmmov 0  }
   0x6   :  { %v51_v8 = vadd.f32 %v50_v5, %v583_v4  ;;  %80 = vperm.xlu1 %475, %v67_v23   ;;  %v70_v27 = vld [vmem:[%s695_s2 + $0x18] sm:$0xff]  ;;  %v72_v28 = vld [vmem:[%s697_s4] sm:$0xff]  ;;  %v64_v35 = vld [vmem:[%s694_s1 + $0x8] sm:$0xff]  ;;  %v510_v39 = vmov 0.0   ;;  %vm205_vm3 = vcmask 261120   ;;  %vm377_vm4 = vcmask 7168  }
   0x7   :  { %v44_v18 = vmax.f32 %v40_v11, %v41_v14  ;;  %v45_v19 = vmax.f32 %v42_v15, %v43_v12  ;;  %vm61_vm1 = vcmp.eq.s32.totalorder %v60_v30, 0  ;;  %v65_v36 = vld [vmem:[%s694_s1 + $0x10] sm:$0xff]  ;;  %v66_v37 = vld [vmem:[%s694_s1 + $0x18] sm:$0xff]  ;;  %455 = vmatprep.mubr.msk.f32.mxu1 %vm509_vm2, %v510_v39  ;;  %v71_v58 = vld [vmem:[%s696_s3] sm:$0xff] }
   0x8   :  { %v52_v13 = vadd.f32 %v51_v8, %v589_v6  ;;  %v73_v59 = vld [vmem:[%s698_s5] sm:$0xff]  ;;  %v74_v11 = vld [vmem:[%s698_s5 + $0x8] sm:$0xff] }
   0x9   :  { %v46_v21 = vmax.f32 %v44_v18, %v45_v19  ;;  %v76_v12 = vld [vmem:[%s699_s6 + $0x8] sm:$0xff]  ;;  %v77_v18 = vld [vmem:[%s700_s7] sm:$0xff]  ;;  %s512_s7 = smov [#allocation2]  }
   0xa   :  { %v53_v16 = vadd.f32 %v52_v13, %v600_v9  ;;  %85 = vperm.xlu1 %475, %v68_v26   ;;  %v75_v19 = vld [vmem:[%s699_s6] sm:$0xff]  ;;  %s406_s30 = sshll.u32 %s512_s7, 4  ;;  %s407_s30 = int_to_ptr.vmem [resolvable:$true] %s406_s30 }
   0xb   :  { %s483_s6 = scalar_lea.vmem %s407_s30, 1024  ;;  %p488_p1 = scmp.lt.s32.totalorder %s407_s30, %s407_s30 }
   0xc   :  { %v54_v17 = vadd.f32 %v53_v16, %v605_v10  ;;  %p484_p0 = scmp.ne.s32.totalorder %s407_s30, %s483_s6  ;;  %p489_p2 = scmp.lt.s32.totalorder %s483_s6, %s483_s6 }
   0xe   :  { %v55_v20 = vadd.f32 %v54_v17, %v594_v7  ;;  %95 = vperm.xlu1 %475, %v70_v27   ;;  %p490_p3 = por %p489_p2, %p488_p1 }
  0x10   :  { %56 = vadd.xlane.f32.xlu0 %v55_v20  ;;  %p491_p4 = pnand %p490_p3, %p484_p0 }
  0x12   :  { %202 = vperm.xlu1 %475, %v72_v28  }
  0x14   :  { %47 = vmax.xlane.f32.xlu0 %v46_v21 }
  0x2a   :  { %90 = vperm.xlu0 %476, %v69_v25  }
  0x85   :  { %v81_v40 = vpop.permute.xlu1 %80 }
  0x89   :  { %v86_v41 = vpop.permute.xlu1 %85 }
  0x8d   :  { %v96_v48 = vpop.permute.xlu1 %95 }
  0x91   :  { %v203_v60 = vpop.permute.xlu1 %202 }
  0x9d   :  { %v57_v31 = vpop.xlane.xlu0 %56 }
  0x9e   :  { %v58_v32 = vmul.f32 0.0009765625, %v57_v31 }
  0xa1   :  { %v48_v33 = vpop.xlane.xlu0 %47 }
  0xa2   :  { %v62_v34 = vsel %vm61_vm1, %v48_v33, %v58_v32 }
  0xa3   :  { %439 = vmatprep.subr.mxu0 %v62_v34 }
  0xa4   :  { %440 = vmatpush3.msra.mxu0 %v62_v34 }
  0xa5   :  { %442 = vmatmul.mubr.msk.f32.vlgmr.msra.gmra.mrb[0].mxu0 %vm98_vm0, %v64_v35 }
  0xa6   :  { %444 = vmatprep.mubr.msk.f32.mxu0 %vm98_vm0, %v65_v36 }
  0xa9   :  { %445 = vmatmul.mubr.msk.f32.gmra.mrb[2].mxu0 %vm98_vm0, %v66_v37  ;;  %v91_v47 = vpop.permute.xlu0 %90 }
  0xaa   :  { %460 = vmatprep.mubr.msk.f32.mxu0 %vm98_vm0, %v73_v59 }
 0x178   :  { %v443_v42 = vpop.f32.mrb[0].mxu0 }
 0x179   :  { %v183_v43 = vadd.f32 %v443_v42, %v86_v41  ;;  %v177_v44 = vpop.f32.mrb[1].mxu0 }
 0x17a   :  { %v178_v45 = vadd.f32 %v177_v44, %v81_v40 }
 0x17b   :  { %v197_v46 = vmax.f32 %v183_v43, 0.0 }
 0x17c   :  { %v196_v49 = vmax.f32 %v178_v45, 0.0  ;;  %v446_v50 = vpop.f32.mrb[2].mxu0 }
 0x17d   :  { %v193_v51 = vadd.f32 %v446_v50, %v96_v48  ;;  %v187_v52 = vpop.f32.mrb[3].mxu0 }
 0x17e   :  { %v188_v53 = vadd.f32 %v187_v52, %v91_v47  ;;  %v464_v54 = vpack.c.bf16 %v197_v46, %v196_v49 }
 0x17f   :  { %v199_v55 = vmax.f32 %v193_v51, 0.0 }
 0x180   :  { %v198_v56 = vmax.f32 %v188_v53, 0.0  ;;  %465 = vmatpush3.bf16.msra.mxu1 %v464_v54 }
 0x181   :  { %466 = vmatprep.subr.bf16.mxu1 %v508_v38 }
 0x182   :  { %v467_v57 = vpack.c.bf16 %v199_v55, %v198_v56 }
 0x184   :  { %468 = vmatpush3.bf16.msra.mxu1 %v467_v57 }
 0x187   :  { %456 = vmatmul.mubr.msk.f32.vlgmr.msra.gmra.mrb[0].mxu1 %vm205_vm3, %v71_v58 }
 0x25a   :  { %v275_v61 = vpop.f32.mrb[0].mxu1 }
 0x25b   :  { %v276_v62 = vadd.f32 %v275_v61, %v203_v60  ;;  %v457_v63 = vpop.f32.mrb[1].mxu1 }
 0x25d   :  { %280 = vrot.lane.b32.xlu1 %v276_v62, %s511_s22 }
 0x2cf   :  { %v281_v3 = vpop.permute.xlu1 %280 }
 0x2d0   :  { %v283_v5 = vadd.f32 %v281_v3, %v276_v62 }
 0x2d2   :  { %v284_v8 = vmax.f32 %v283_v5, 0.0 }
 0x2d4   :  { %458 = vmatprep.subr.mxu0 %v284_v8 }
 0x2d5   :  { %459 = vmatpush3.msra.mxu0 %v284_v8 }
 0x2d6   :  { %461 = vmatmul.mubr.msk.f32.vlgmr.msra.gmra.mrb[4].mxu0 %vm98_vm0, %v74_v11 }
 0x3a9   :  { %v462_v13 = vpop.f32.mrb[4].mxu0 }
 0x3aa   :  { %v363_v14 = vadd.f32 %v462_v13, %v76_v12  ;;  %v357_v15 = vpop.f32.mrb[5].mxu0 }
 0x3ab   :  { %v358_v21 = vadd.f32 %v357_v15, %v75_v19 }
 0x3ac   :  { %v366_v16 = vmul.f32 0.5, %v363_v14 }
 0x3ae   :  { %v367_v17 = vmul.f32 1.442695, %v366_v16 }
 0x3b0   :  { %477 = vpow2.f32 %v367_v17 }
 0x3ba   :  { %v478_v20 = vpop.eup %477 }
 0x3bb   :  { %v369_v22 = vmul.f32 %v478_v20, %v77_v18 }
 0x3bd   :  { %v370_v23 = vadd.f32 %v369_v22, %v358_v21 }
 0x3bf   :  { %v425_v24 = vmul.f32 -1.442695, %v370_v23 }
 0x3c1   :  { %479 = vpow2.f32 %v425_v24 }
 0x3cb   :  { %v480_v25 = vpop.eup %479 }
 0x3cc   :  { %v374_v26 = vadd.f32 1.0, %v480_v25 }
 0x3ce   :  { %481 = vrcp.f32 %v374_v26 }
 0x3d8   :  { %v482_v27 = vpop.eup %481 }
 0x3d9   :  { %378 = vst.msk [vmem:[%s702_s9] sm:$0xff] %vm377_vm4, %v482_v27  ;;  %381 = vperm.xlu1 %475, %v482_v27  }
 0x458   :  { %v382_v28 = vpop.permute.xlu1 %381 }
 0x459   :  { %v384_v29 = vmul.f32 %v382_v28, %v566_v0  ;;  %v385_v30 = vmul.f32 %v382_v28, %v571_v1  ;;  %v386_v31 = vmul.f32 %v382_v28, %v576_v2  ;;  %v387_v32 = vmul.f32 %v382_v28, %v583_v4 }
 0x45a   :  { %v388_v33 = vmul.f32 %v382_v28, %v589_v6  ;;  %v389_v34 = vmul.f32 %v382_v28, %v600_v9  ;;  %v390_v35 = vmul.f32 %v382_v28, %v605_v10  ;;  %v391_v36 = vmul.f32 %v382_v28, %v594_v7 }
 0x45b   :  { %392 = vst [vmem:[#allocation2] sm:$0xff] %v384_v29  ;;  %393 = vst [vmem:[#allocation2 + $0x8] sm:$0xff] %v385_v30 }
 0x45c   :  { %394 = vst [vmem:[#allocation2 + $0x10] sm:$0xff] %v386_v31  ;;  %395 = vst [vmem:[#allocation2 + $0x18] sm:$0xff] %v387_v32 }
 0x45d   :  { %396 = vst [vmem:[#allocation2 + $0x20] sm:$0xff] %v388_v33  ;;  %397 = vst [vmem:[#allocation2 + $0x28] sm:$0xff] %v389_v34 }
 0x45e   :  { %398 = vst [vmem:[#allocation2 + $0x30] sm:$0xff] %v390_v35  ;;  %399 = vst [vmem:[#allocation2 + $0x38] sm:$0xff] %v391_v36 }
 0x45f   :  { %494 = shalt.err (!%p491_p4)
}
 0x460   :  { %s495_s11 = scalar_lea.hbm %s701_s8, 1024 }
 0x461   :  { %p496_p5 = scmp.ne.s32.totalorder %s701_s8, %s495_s11  ;;  %p499_p6 = scmp.lt.u32.totalorder %s495_s11, %s701_s8 }
 0x463   :  { %p501_p7 = pnand %p499_p6, %p496_p5 }
 0x465   :  { %504 = shalt.err (!%p501_p7)
}
 0x466   :  { %409 = dma.vmem_to_hbm [thread:$0]  %s407_s30, 1024, %s701_s8, [#allocation3]  }
 0x467   :  { %505 = dma.done.wait [#allocation3], 1024  }
 0x468   :  { %506 = vsyncadd [#allocation3], 4294966272 }
 0x469   :  { %417 = vsyncpa [#allocation3], 1 }

</bundles_post_ra>
